<compile_context>
chip_gen: v7x
topology: tpu7x:2x2x1
jax: 0.10.0
libtpu: 0.0.40
codegen_flags: <defaults>
</compile_context>

<pallas_src>
import jax
import jax.numpy as jnp
from jax import lax
from jax.experimental import pallas as pl
from jax.experimental.pallas import tpu as pltpu


_SUB, _LANE = 8, 128                      # f32 vreg tile
_TARGET_BLOCK_BYTES = 2 * 1024 * 1024     # VMEM footprint per input per buffer
_VMEM_LIMIT_BYTES = 40 * 1024 * 1024      # explicit (v5e default is only 16 MiB)


def _fs2_loss_kernel(bmap_ref, rbmap_ref, thr_ref,          # scalar prefetch (SMEM)
                     after_ref, before_ref, ys_ref,
                     d_ref, ds_ref, p_ref, ps_ref, ilens_ref,
                     l1_ref, dur_ref, pitch_ref,
                     acc_ref):
    del bmap_ref, rbmap_ref                                   # used by index_maps only
    c = pl.program_id(0)            # which half of the block stream (core split)
    j = pl.program_id(1)            # block index within the half
    nj = pl.num_programs(1)

    tile_r, lanes = after_ref.shape

    @pl.when(j == 0)
    def _init():
        acc_ref[...] = jnp.zeros_like(acc_ref)

    # ---- masked L1 numerator for this block --------------------------------
    # One scalar threshold per block (precomputed in the wrapper); phantom
    # blocks carry thr=0, ragged tails fall out of `pos < thr` automatically.
    thr = thr_ref[c * nj + j]
    pos = (lax.broadcasted_iota(jnp.int32, (tile_r, lanes), 0) * lanes
           + lax.broadcasted_iota(jnp.int32, (tile_r, lanes), 1))
    mask = pos < thr

    ys = ys_ref[...].astype(jnp.float32)
    diff = (jnp.abs(before_ref[...].astype(jnp.float32) - ys)
            + jnp.abs(after_ref[...].astype(jnp.float32) - ys))
    masked = jnp.where(mask, diff, 0.0)                       # select, not multiply

    if tile_r % _SUB == 0:
        # VPU-only fold onto the (8, lanes) accumulator: each 8-row group is a
        # whole vreg row-tile, so this is elementwise vreg adds (no XLU).
        acc_ref[...] += jnp.sum(masked.reshape(tile_r // _SUB, _SUB, lanes), axis=0)
    else:
        # Tiny-tensor path (rows-per-batch < 8): a single full reduce per block
        # is negligible here; scalar is broadcast over the accumulator.
        acc_ref[...] += jnp.sum(masked)

    # ---- finalize: write per-half partial sums ------------------------------
    @pl.when(j == nj - 1)
    def _finalize():
        l1_ref[...] = acc_ref[...]
        dur_ref[...] = jnp.zeros_like(dur_ref)
        pitch_ref[...] = jnp.zeros_like(pitch_ref)

    @pl.when(jnp.logical_and(j == nj - 1, c == 0))
    def _token_losses():
        Bt, T_text = d_ref.shape
        tmask = lax.broadcasted_iota(jnp.int32, (Bt, T_text), 1) < ilens_ref[...]
        log_ds = jnp.log(ds_ref[...].astype(jnp.float32) + 1.0)
        d_sq = (d_ref[...].astype(jnp.float32) - log_ds) ** 2
        dur_sum = jnp.sum(jnp.where(tmask, d_sq, 0.0))
        dur_ref[...] = jnp.full(dur_ref.shape, dur_sum, dur_ref.dtype)
        p_sq = (p_ref[...].astype(jnp.float32) - ps_ref[...].astype(jnp.float32)) ** 2
        pitch_sum = jnp.sum(jnp.where(tmask, p_sq, 0.0))
        pitch_ref[...] = jnp.full(pitch_ref.shape, pitch_sum, pitch_ref.dtype)


def fastspeech2_loss(after_outs, before_outs, d_outs, p_outs,
                     ys, ds, ps, ilens, olens):
    """Returns (l1_loss, duration_loss, pitch_loss) as float32 scalars."""
    B, T_feats, odim = before_outs.shape
    _, T_text = d_outs.shape
    F = T_feats * odim
    itemsize = jnp.dtype(before_outs.dtype).itemsize

    # ---- choose a sublane-dense per-batch view -------------------------------
    if F % _LANE == 0:
        rows, lanes = F // _LANE, _LANE                 # fully lane-dense fold
        view = lambda x: x.reshape(B, rows, lanes)      # free row-major regroup
    else:
        rows, lanes = T_feats, odim                     # frame-major fallback view
        view = lambda x: x
    after_v, before_v, ys_v = view(after_outs), view(before_outs), view(ys)

    # ---- block size from a VMEM budget (account for lane padding) ------------
    lane_pad = ((lanes + _LANE - 1) // _LANE) * _LANE
    budget_rows = max(_SUB, (_TARGET_BLOCK_BYTES // (lane_pad * itemsize)) // _SUB * _SUB)
    if rows >= _SUB:
        tile_r = min(budget_rows, (rows // _SUB) * _SUB)
    else:
        tile_r = rows                                   # full (tiny) row dim

    per_batch = pl.cdiv(rows, tile_r)                   # row-blocks per batch
    total_blocks = B * per_batch
    num_tiles = pl.cdiv(total_blocks, 2)                # blocks per parallel half
    last = total_blocks - 1

    # ---- lengths (clamped) and per-block scalar tables (scalar prefetch) ----
    olens_c = jnp.minimum(olens.astype(jnp.int32), jnp.int32(T_feats))
    ilens_c = jnp.minimum(ilens.astype(jnp.int32), jnp.int32(T_text))
    olens_sc = olens_c * jnp.int32(odim)                # valid flattened positions

    t_idx = jnp.arange(2 * num_tiles, dtype=jnp.int32)
    real_t = jnp.minimum(t_idx, last)                   # clamp phantoms onto last block
    b_map = (real_t // per_batch).astype(jnp.int32)
    rb_map = (real_t % per_batch).astype(jnp.int32)
    thr_map = jnp.where(t_idx <= last,
                        olens_sc[b_map] - rb_map * jnp.int32(tile_r * lanes),
                        jnp.int32(0)).astype(jnp.int32)

    # ---- small token-level glue ----------------------------------------------
    p2 = jnp.squeeze(p_outs, axis=-1)
    ps2 = jnp.squeeze(ps, axis=-1)
    ilens2 = ilens_c.reshape(B, 1)
    d_f = d_outs.astype(jnp.float32)
    ds_f = ds.astype(jnp.float32)

    # ---- specs ----------------------------------------------------------------
    def feat_map(c, j, bm, rm, tm):
        t = c * num_tiles + j
        return (bm[t], rm[t], 0)

    const_map = lambda c, j, bm, rm, tm: (0, 0)
    out_map = lambda c, j, bm, rm, tm: (c, 0)

    feat_spec = pl.BlockSpec((None, tile_r, lanes), feat_map)
    out_spec = pl.BlockSpec((_SUB, lanes), out_map)
    out_sds = jax.ShapeDtypeStruct((2 * _SUB, lanes), jnp.float32)

    grid_spec = pltpu.PrefetchScalarGridSpec(
        num_scalar_prefetch=3,
        grid=(2, num_tiles),
        in_specs=[feat_spec, feat_spec, feat_spec,
                  pl.BlockSpec((B, T_text), const_map),
                  pl.BlockSpec((B, T_text), const_map),
                  pl.BlockSpec((B, T_text), const_map),
                  pl.BlockSpec((B, T_text), const_map),
                  pl.BlockSpec((B, 1), const_map)],
        out_specs=(out_spec, out_spec, out_spec),
        scratch_shapes=[pltpu.VMEM((_SUB, lanes), jnp.float32)])

    l1_o, dur_o, pitch_o = pl.pallas_call(
        _fs2_loss_kernel,
        out_shape=(out_sds, out_sds, out_sds),
        grid_spec=grid_spec,
        compiler_params=pltpu.CompilerParams(
            dimension_semantics=("parallel", "arbitrary"),
            vmem_limit_bytes=_VMEM_LIMIT_BYTES),
    )(b_map, rb_map, thr_map,
      after_v, before_v, ys_v, d_f, ds_f, p2, ps2, ilens2)

    # ---- denominators from the (clamped) length vectors ----------------------
    out_count = jnp.sum(olens_c).astype(jnp.float32) * jnp.float32(odim)
    dur_count = jnp.sum(ilens_c).astype(jnp.float32)

    if tile_r % _SUB == 0:
        l1_num = jnp.sum(l1_o)                          # sum the (16, lanes) partials
    else:
        l1_num = l1_o[0, 0] + l1_o[_SUB, 0]             # scalar-accumulate path

    l1_loss = l1_num / out_count
    duration_loss = (dur_o[0, 0] + dur_o[_SUB, 0]) / dur_count
    pitch_loss = (pitch_o[0, 0] + pitch_o[_SUB, 0]) / dur_count
    return l1_loss, duration_loss, pitch_loss


def _reference(after_outs, before_outs, d_outs, p_outs, ys, ds, ps, ilens, olens):
    """Pure-JAX reference mirroring the PyTorch semantics (use_masking=True)."""
    B, T_feats, odim = before_outs.shape
    _, T_text = d_outs.shape
    out_mask = (jnp.arange(T_feats)[None, :] < olens[:, None]).astype(jnp.float32)
    dur_mask = (jnp.arange(T_text)[None, :] < ilens[:, None]).astype(jnp.float32)
    m3 = out_mask[:, :, None]
    cnt = jnp.sum(out_mask) * odim
    l1 = (jnp.sum(jnp.abs(before_outs - ys) * m3)
          + jnp.sum(jnp.abs(after_outs - ys) * m3)) / cnt
    log_ds = jnp.log(ds.astype(jnp.float32) + 1.0)
    dcnt = jnp.sum(dur_mask)
    dur = jnp.sum(((d_outs - log_ds) ** 2) * dur_mask) / dcnt
    pitch = jnp.sum(((p_outs[..., 0] - ps[..., 0]) ** 2) * dur_mask) / dcnt
    return l1, dur, pitch


if __name__ == "__main__":
    key = jax.random.PRNGKey(0)

    def make_inputs(k, B, T_feats, odim, T_text):
        ks = jax.random.split(k, 7)
        after_outs = jax.random.normal(ks[0], (B, T_feats, odim), jnp.float32)
        before_outs = jax.random.normal(ks[1], (B, T_feats, odim), jnp.float32)
        ys = jax.random.normal(ks[2], (B, T_feats, odim), jnp.float32)
        d_outs = jax.random.normal(ks[3], (B, T_text), jnp.float32)
        ds = jax.random.randint(ks[4], (B, T_text), 0, 5, jnp.int32)
        p_outs = jax.random.normal(ks[5], (B, T_text, 1), jnp.float32)
        ps = jax.random.normal(ks[6], (B, T_text, 1), jnp.float32)
        ilens = jnp.array([T_text] + [max(1, T_text - 3)] * (B - 1), jnp.int32)
        olens = jnp.array([T_feats] + [max(1, T_feats - 5)] * (B - 1), jnp.int32)
        return (after_outs, before_outs, d_outs, p_outs, ys, ds, ps, ilens, olens)

    # (B, T_feats, odim, T_text) — exercise every code path:
    configs = [
        (2, 16, 32, 8),    # tiny: rows-per-batch < 8 (scalar-accumulate path)
        (2, 40, 80, 12),   # F % 128 == 0, rows >= 8: folded 128-lane path + ragged rows
        (2, 9, 40, 6),     # F % 128 != 0: frame-major view (lanes = odim)
        (3, 64, 16, 10),   # odd block count: phantom tile on the second half
    ]
    keys = jax.random.split(key, len(configs))
    for cfg_key, (B, T_feats, odim, T_text) in zip(keys, configs):
        args = make_inputs(cfg_key, B, T_feats, odim, T_text)
        l1, dur, pitch = fastspeech2_loss(*args)
        jax.block_until_ready((l1, dur, pitch))
        rl1, rdur, rpitch = _reference(*args)
        assert jnp.allclose(l1, rl1, rtol=1e-5, atol=1e-5), ((B, T_feats, odim), l1, rl1)
        assert jnp.allclose(dur, rdur, rtol=1e-5, atol=1e-5), ((B, T_feats, odim), dur, rdur)
        assert jnp.allclose(pitch, rpitch, rtol=1e-5, atol=1e-5), ((B, T_feats, odim), pitch, rpitch)

    print("KERNEL_OK")
</pallas_src>

<mosaic_0001>
module attributes {stable_mosaic.version = 11 : i64} {
  func.func @_fs2_loss_kernel(%arg0: i32, %arg1: i32, %arg2: memref<2xi32, #tpu.memory_space<smem>>, %arg3: memref<2xi32, #tpu.memory_space<smem>>, %arg4: memref<2xi32, #tpu.memory_space<smem>>, %arg5: memref<1x4x128xf32, #tpu.memory_space<vmem>>, %arg6: memref<1x4x128xf32, #tpu.memory_space<vmem>>, %arg7: memref<1x4x128xf32, #tpu.memory_space<vmem>>, %arg8: memref<2x8xf32, #tpu.memory_space<vmem>>, %arg9: memref<2x8xf32, #tpu.memory_space<vmem>>, %arg10: memref<2x8xf32, #tpu.memory_space<vmem>>, %arg11: memref<2x8xf32, #tpu.memory_space<vmem>>, %arg12: memref<2x1xi32, #tpu.memory_space<vmem>>, %arg13: memref<8x128xf32, #tpu.memory_space<vmem>>, %arg14: memref<8x128xf32, #tpu.memory_space<vmem>>, %arg15: memref<8x128xf32, #tpu.memory_space<vmem>>, %arg16: memref<8x128xf32, #tpu.memory_space<vmem>>) attributes {dimension_semantics = [#tpu.dimension_semantics<parallel>, #tpu.dimension_semantics<arbitrary>], iteration_bounds = array<i64: 2, 1>, scalar_prefetch = 3 : i64, scratch_operands = 1 : i64, tpu.core_type = #tpu.core_type<tc>, window_params = [{transform_indices = @transform_0, window_bounds = array<i64: 1, 4, 128>}, {transform_indices = @transform_1, window_bounds = array<i64: 1, 4, 128>}, {transform_indices = @transform_2, window_bounds = array<i64: 1, 4, 128>}, {pipeline_mode = #tpu.pipeline_mode<synchronous>, transform_indices = @transform_3, window_bounds = array<i64: 2, 8>}, {pipeline_mode = #tpu.pipeline_mode<synchronous>, transform_indices = @transform_4, window_bounds = array<i64: 2, 8>}, {pipeline_mode = #tpu.pipeline_mode<synchronous>, transform_indices = @transform_5, window_bounds = array<i64: 2, 8>}, {pipeline_mode = #tpu.pipeline_mode<synchronous>, transform_indices = @transform_6, window_bounds = array<i64: 2, 8>}, {pipeline_mode = #tpu.pipeline_mode<synchronous>, transform_indices = @transform_7, window_bounds = array<i64: 2, 1>}, {transform_indices = @transform_8, window_bounds = array<i64: 8, 128>}, {transform_indices = @transform_9, window_bounds = array<i64: 8, 128>}, {transform_indices = @transform_10, window_bounds = array<i64: 8, 128>}]} {
    %c0_i32 = arith.constant 0 : i32
    %0 = arith.cmpi eq, %arg1, %c0_i32 : i32
    %1 = arith.extui %0 : i1 to i32
    %c0_i32_0 = arith.constant 0 : i32
    %2 = arith.cmpi ne, %1, %c0_i32_0 : i32
    scf.if %2 {
      %cst_19 = arith.constant 0.000000e+00 : f32
      %43 = vector.broadcast %cst_19 : f32 to vector<8x128xf32>
      %c0_20 = arith.constant 0 : index
      %c0_21 = arith.constant 0 : index
      %44 = vector.load %arg16[%c0_20, %c0_21] : memref<8x128xf32, #tpu.memory_space<vmem>>, vector<8x128xf32>
      tpu.vector_store %arg16[%c0_20, %c0_21], %43 {strides = array<i32>} : memref<8x128xf32, #tpu.memory_space<vmem>>, vector<8x128xf32>,
    } else {
    }
    %c1_i32 = arith.constant 1 : i32
    %3 = arith.muli %arg0, %c1_i32 : i32
    %4 = arith.addi %3, %arg1 : i32
    %5 = arith.index_cast %4 : i32 to index
    %6 = memref.load %arg4[%5] : memref<2xi32, #tpu.memory_space<smem>>
    %7 = tpu.iota {dimensions = array<i32: 0>} : vector<4x128xi32>
    %c128_i32 = arith.constant 128 : i32
    %8 = vector.broadcast %c128_i32 : i32 to vector<4x128xi32>
    %9 = arith.muli %7, %8 : vector<4x128xi32>
    %10 = tpu.iota {dimensions = array<i32: 1>} : vector<4x128xi32>
    %11 = arith.addi %9, %10 : vector<4x128xi32>
    %12 = vector.broadcast %6 : i32 to vector<4x128xi32>
    %13 = arith.cmpi slt, %11, %12 : vector<4x128xi32>
    %c0 = arith.constant 0 : index
    %c0_1 = arith.constant 0 : index
    %c0_2 = arith.constant 0 : index
    %14 = vector.load %arg7[%c0, %c0_1, %c0_2] : memref<1x4x128xf32, #tpu.memory_space<vmem>>, vector<1x4x128xf32>
    %15 = vector.shape_cast %14 : vector<1x4x128xf32> to vector<4x128xf32>
    %c0_3 = arith.constant 0 : index
    %c0_4 = arith.constant 0 : index
    %c0_5 = arith.constant 0 : index
    %16 = vector.load %arg6[%c0_3, %c0_4, %c0_5] : memref<1x4x128xf32, #tpu.memory_space<vmem>>, vector<1x4x128xf32>
    %17 = vector.shape_cast %16 : vector<1x4x128xf32> to vector<4x128xf32>
    %18 = arith.subf %17, %15 : vector<4x128xf32>
    %19 = math.absf %18 : vector<4x128xf32>
    %c0_6 = arith.constant 0 : index
    %c0_7 = arith.constant 0 : index
    %c0_8 = arith.constant 0 : index
    %20 = vector.load %arg5[%c0_6, %c0_7, %c0_8] : memref<1x4x128xf32, #tpu.memory_space<vmem>>, vector<1x4x128xf32>
    %21 = vector.shape_cast %20 : vector<1x4x128xf32> to vector<4x128xf32>
    %22 = arith.subf %21, %15 : vector<4x128xf32>
    %23 = math.absf %22 : vector<4x128xf32>
    %24 = arith.addf %19, %23 : vector<4x128xf32>
    %cst = arith.constant 0.000000e+00 : f32
    %25 = vector.broadcast %cst : f32 to vector<4x128xf32>
    %26 = arith.select %13, %24, %25 : vector<4x128xi1>, vector<4x128xf32>
    %c0_9 = arith.constant 0 : index
    %c0_10 = arith.constant 0 : index
    %27 = vector.load %arg16[%c0_9, %c0_10] : memref<8x128xf32, #tpu.memory_space<vmem>>, vector<8x128xf32>
    %28 = vector.shape_cast %26 : vector<4x128xf32> to vector<1x4x128xf32>
    %cst_11 = arith.constant dense<0.000000e+00> : vector<1xf32>
    %29 = vector.multi_reduction <add>, %28, %cst_11 [1, 2] : vector<1x4x128xf32> to vector<1xf32>
    %30 = vector.shape_cast %29 : vector<1xf32> to vector<1x1x1xf32>
    %31 = vector.extract %30[0, 0, 0] : f32 from vector<1x1x1xf32>
    %32 = vector.broadcast %31 : f32 to vector<8x128xf32>
    %33 = arith.addf %27, %32 : vector<8x128xf32>
    %c0_12 = arith.constant 0 : index
    %c0_13 = arith.constant 0 : index
    %34 = vector.load %arg16[%c0_12, %c0_13] : memref<8x128xf32, #tpu.memory_space<vmem>>, vector<8x128xf32>
    tpu.vector_store %arg16[%c0_12, %c0_13], %33 {strides = array<i32>} : memref<8x128xf32, #tpu.memory_space<vmem>>, vector<8x128xf32>,
    %c0_i32_14 = arith.constant 0 : i32
    %35 = arith.cmpi eq, %arg1, %c0_i32_14 : i32
    %36 = arith.extui %35 : i1 to i32
    %c0_i32_15 = arith.constant 0 : i32
    %37 = arith.cmpi ne, %36, %c0_i32_15 : i32
    scf.if %37 {
      %c0_19 = arith.constant 0 : index
      %c0_20 = arith.constant 0 : index
      %43 = vector.load %arg16[%c0_19, %c0_20] : memref<8x128xf32, #tpu.memory_space<vmem>>, vector<8x128xf32>
      %c0_21 = arith.constant 0 : index
      %c0_22 = arith.constant 0 : index
      %44 = vector.load %arg13[%c0_21, %c0_22] : memref<8x128xf32, #tpu.memory_space<vmem>>, vector<8x128xf32>
      tpu.vector_store %arg13[%c0_21, %c0_22], %43 {strides = array<i32>} : memref<8x128xf32, #tpu.memory_space<vmem>>, vector<8x128xf32>,
      %cst_23 = arith.constant 0.000000e+00 : f32
      %45 = vector.broadcast %cst_23 : f32 to vector<8x128xf32>
      %c0_24 = arith.constant 0 : index
      %c0_25 = arith.constant 0 : index
      %46 = vector.load %arg14[%c0_24, %c0_25] : memref<8x128xf32, #tpu.memory_space<vmem>>, vector<8x128xf32>
      tpu.vector_store %arg14[%c0_24, %c0_25], %45 {strides = array<i32>} : memref<8x128xf32, #tpu.memory_space<vmem>>, vector<8x128xf32>,
      %cst_26 = arith.constant 0.000000e+00 : f32
      %47 = vector.broadcast %cst_26 : f32 to vector<8x128xf32>
      %c0_27 = arith.constant 0 : index
      %c0_28 = arith.constant 0 : index
      %48 = vector.load %arg15[%c0_27, %c0_28] : memref<8x128xf32, #tpu.memory_space<vmem>>, vector<8x128xf32>
      tpu.vector_store %arg15[%c0_27, %c0_28], %47 {strides = array<i32>} : memref<8x128xf32, #tpu.memory_space<vmem>>, vector<8x128xf32>,
    } else {
    }
    %c0_i32_16 = arith.constant 0 : i32
    %38 = arith.cmpi eq, %arg1, %c0_i32_16 : i32
    %c0_i32_17 = arith.constant 0 : i32
    %39 = arith.cmpi eq, %arg0, %c0_i32_17 : i32
    %40 = arith.andi %38, %39 : i1
    %41 = arith.extui %40 : i1 to i32
    %c0_i32_18 = arith.constant 0 : i32
    %42 = arith.cmpi ne, %41, %c0_i32_18 : i32
    scf.if %42 {
      %43 = tpu.iota {dimensions = array<i32: 1>} : vector<2x8xi32>
      %c0_19 = arith.constant 0 : index
      %c0_20 = arith.constant 0 : index
      %44 = vector.load %arg12[%c0_19, %c0_20] : memref<2x1xi32, #tpu.memory_space<vmem>>, vector<2x1xi32>
      %45 = vector.broadcast %44 : vector<2x1xi32> to vector<2x8xi32>
      %46 = arith.cmpi slt, %43, %45 : vector<2x8xi32>
      %c0_21 = arith.constant 0 : index
      %c0_22 = arith.constant 0 : index
      %47 = vector.load %arg9[%c0_21, %c0_22] : memref<2x8xf32, #tpu.memory_space<vmem>>, vector<2x8xf32>
      %cst_23 = arith.constant 1.000000e+00 : f32
      %48 = vector.broadcast %cst_23 : f32 to vector<2x8xf32>
      %49 = arith.addf %47, %48 : vector<2x8xf32>
      %50 = math.log %49 : vector<2x8xf32>
      %c0_24 = arith.constant 0 : index
      %c0_25 = arith.constant 0 : index
      %51 = vector.load %arg8[%c0_24, %c0_25] : memref<2x8xf32, #tpu.memory_space<vmem>>, vector<2x8xf32>
      %52 = arith.subf %51, %50 : vector<2x8xf32>
      %53 = arith.mulf %52, %52 : vector<2x8xf32>
      %cst_26 = arith.constant 0.000000e+00 : f32
      %54 = vector.broadcast %cst_26 : f32 to vector<2x8xf32>
      %55 = arith.select %46, %53, %54 : vector<2x8xi1>, vector<2x8xf32>
      %56 = vector.shape_cast %55 : vector<2x8xf32> to vector<1x2x8xf32>
      %cst_27 = arith.constant dense<0.000000e+00> : vector<1xf32>
      %57 = vector.multi_reduction <add>, %56, %cst_27 [1, 2] : vector<1x2x8xf32> to vector<1xf32>
      %58 = vector.shape_cast %57 : vector<1xf32> to vector<1x1x1xf32>
      %59 = vector.extract %58[0, 0, 0] : f32 from vector<1x1x1xf32>
      %60 = vector.broadcast %59 : f32 to vector<8x128xf32>
      %c0_28 = arith.constant 0 : index
      %c0_29 = arith.constant 0 : index
      %61 = vector.load %arg14[%c0_28, %c0_29] : memref<8x128xf32, #tpu.memory_space<vmem>>, vector<8x128xf32>
      tpu.vector_store %arg14[%c0_28, %c0_29], %60 {strides = array<i32>} : memref<8x128xf32, #tpu.memory_space<vmem>>, vector<8x128xf32>,
      %c0_30 = arith.constant 0 : index
      %c0_31 = arith.constant 0 : index
      %62 = vector.load %arg10[%c0_30, %c0_31] : memref<2x8xf32, #tpu.memory_space<vmem>>, vector<2x8xf32>
      %c0_32 = arith.constant 0 : index
      %c0_33 = arith.constant 0 : index
      %63 = vector.load %arg11[%c0_32, %c0_33] : memref<2x8xf32, #tpu.memory_space<vmem>>, vector<2x8xf32>
      %64 = arith.subf %62, %63 : vector<2x8xf32>
      %65 = arith.mulf %64, %64 : vector<2x8xf32>
      %cst_34 = arith.constant 0.000000e+00 : f32
      %66 = vector.broadcast %cst_34 : f32 to vector<2x8xf32>
      %67 = arith.select %46, %65, %66 : vector<2x8xi1>, vector<2x8xf32>
      %68 = vector.shape_cast %67 : vector<2x8xf32> to vector<1x2x8xf32>
      %cst_35 = arith.constant dense<0.000000e+00> : vector<1xf32>
      %69 = vector.multi_reduction <add>, %68, %cst_35 [1, 2] : vector<1x2x8xf32> to vector<1xf32>
      %70 = vector.shape_cast %69 : vector<1xf32> to vector<1x1x1xf32>
      %71 = vector.extract %70[0, 0, 0] : f32 from vector<1x1x1xf32>
      %72 = vector.broadcast %71 : f32 to vector<8x128xf32>
      %c0_36 = arith.constant 0 : index
      %c0_37 = arith.constant 0 : index
      %73 = vector.load %arg15[%c0_36, %c0_37] : memref<8x128xf32, #tpu.memory_space<vmem>>, vector<8x128xf32>
      tpu.vector_store %arg15[%c0_36, %c0_37], %72 {strides = array<i32>} : memref<8x128xf32, #tpu.memory_space<vmem>>, vector<8x128xf32>,
    } else {
    }
    return
  }
  func.func @transform_0(%arg0: i32, %arg1: i32, %arg2: memref<2xi32, #tpu.memory_space<smem>>, %arg3: memref<2xi32, #tpu.memory_space<smem>>, %arg4: memref<2xi32, #tpu.memory_space<smem>>) -> (i32, i32, i32) {
    %c1_i32 = arith.constant 1 : i32
    %0 = arith.muli %arg0, %c1_i32 : i32
    %1 = arith.addi %0, %arg1 : i32
    %2 = arith.index_cast %1 : i32 to index
    %3 = memref.load %arg2[%2] : memref<2xi32, #tpu.memory_space<smem>>
    %4 = arith.index_cast %1 : i32 to index
    %5 = memref.load %arg3[%4] : memref<2xi32, #tpu.memory_space<smem>>
    %c0_i32 = arith.constant 0 : i32
    %c0_i32_0 = arith.constant 0 : i32
    return %3, %5, %c0_i32 : i32, i32, i32
  }
  func.func @transform_1(%arg0: i32, %arg1: i32, %arg2: memref<2xi32, #tpu.memory_space<smem>>, %arg3: memref<2xi32, #tpu.memory_space<smem>>, %arg4: memref<2xi32, #tpu.memory_space<smem>>) -> (i32, i32, i32) {
    %c1_i32 = arith.constant 1 : i32
    %0 = arith.muli %arg0, %c1_i32 : i32
    %1 = arith.addi %0, %arg1 : i32
    %2 = arith.index_cast %1 : i32 to index
    %3 = memref.load %arg2[%2] : memref<2xi32, #tpu.memory_space<smem>>
    %4 = arith.index_cast %1 : i32 to index
    %5 = memref.load %arg3[%4] : memref<2xi32, #tpu.memory_space<smem>>
    %c0_i32 = arith.constant 0 : i32
    %c0_i32_0 = arith.constant 0 : i32
    return %3, %5, %c0_i32 : i32, i32, i32
  }
  func.func @transform_2(%arg0: i32, %arg1: i32, %arg2: memref<2xi32, #tpu.memory_space<smem>>, %arg3: memref<2xi32, #tpu.memory_space<smem>>, %arg4: memref<2xi32, #tpu.memory_space<smem>>) -> (i32, i32, i32) {
    %c1_i32 = arith.constant 1 : i32
    %0 = arith.muli %arg0, %c1_i32 : i32
    %1 = arith.addi %0, %arg1 : i32
    %2 = arith.index_cast %1 : i32 to index
    %3 = memref.load %arg2[%2] : memref<2xi32, #tpu.memory_space<smem>>
    %4 = arith.index_cast %1 : i32 to index
    %5 = memref.load %arg3[%4] : memref<2xi32, #tpu.memory_space<smem>>
    %c0_i32 = arith.constant 0 : i32
    %c0_i32_0 = arith.constant 0 : i32
    return %3, %5, %c0_i32 : i32, i32, i32
  }
  func.func @transform_3(%arg0: i32, %arg1: i32, %arg2: memref<2xi32, #tpu.memory_space<smem>>, %arg3: memref<2xi32, #tpu.memory_space<smem>>, %arg4: memref<2xi32, #tpu.memory_space<smem>>) -> (i32, i32) {
    %c0_i32 = arith.constant 0 : i32
    %c0_i32_0 = arith.constant 0 : i32
    %c0_i32_1 = arith.constant 0 : i32
    return %c0_i32, %c0_i32_0 : i32, i32
  }
  func.func @transform_4(%arg0: i32, %arg1: i32, %arg2: memref<2xi32, #tpu.memory_space<smem>>, %arg3: memref<2xi32, #tpu.memory_space<smem>>, %arg4: memref<2xi32, #tpu.memory_space<smem>>) -> (i32, i32) {
    %c0_i32 = arith.constant 0 : i32
    %c0_i32_0 = arith.constant 0 : i32
    %c0_i32_1 = arith.constant 0 : i32
    return %c0_i32, %c0_i32_0 : i32, i32
  }
  func.func @transform_5(%arg0: i32, %arg1: i32, %arg2: memref<2xi32, #tpu.memory_space<smem>>, %arg3: memref<2xi32, #tpu.memory_space<smem>>, %arg4: memref<2xi32, #tpu.memory_space<smem>>) -> (i32, i32) {
    %c0_i32 = arith.constant 0 : i32
    %c0_i32_0 = arith.constant 0 : i32
    %c0_i32_1 = arith.constant 0 : i32
    return %c0_i32, %c0_i32_0 : i32, i32
  }
  func.func @transform_6(%arg0: i32, %arg1: i32, %arg2: memref<2xi32, #tpu.memory_space<smem>>, %arg3: memref<2xi32, #tpu.memory_space<smem>>, %arg4: memref<2xi32, #tpu.memory_space<smem>>) -> (i32, i32) {
    %c0_i32 = arith.constant 0 : i32
    %c0_i32_0 = arith.constant 0 : i32
    %c0_i32_1 = arith.constant 0 : i32
    return %c0_i32, %c0_i32_0 : i32, i32
  }
  func.func @transform_7(%arg0: i32, %arg1: i32, %arg2: memref<2xi32, #tpu.memory_space<smem>>, %arg3: memref<2xi32, #tpu.memory_space<smem>>, %arg4: memref<2xi32, #tpu.memory_space<smem>>) -> (i32, i32) {
    %c0_i32 = arith.constant 0 : i32
    %c0_i32_0 = arith.constant 0 : i32
    %c0_i32_1 = arith.constant 0 : i32
    return %c0_i32, %c0_i32_0 : i32, i32
  }
  func.func @transform_8(%arg0: i32, %arg1: i32, %arg2: memref<2xi32, #tpu.memory_space<smem>>, %arg3: memref<2xi32, #tpu.memory_space<smem>>, %arg4: memref<2xi32, #tpu.memory_space<smem>>) -> (i32, i32) {
    %c0_i32 = arith.constant 0 : i32
    %c0_i32_0 = arith.constant 0 : i32
    return %arg0, %c0_i32 : i32, i32
  }
  func.func @transform_9(%arg0: i32, %arg1: i32, %arg2: memref<2xi32, #tpu.memory_space<smem>>, %arg3: memref<2xi32, #tpu.memory_space<smem>>, %arg4: memref<2xi32, #tpu.memory_space<smem>>) -> (i32, i32) {
    %c0_i32 = arith.constant 0 : i32
    %c0_i32_0 = arith.constant 0 : i32
    return %arg0, %c0_i32 : i32, i32
  }
  func.func @transform_10(%arg0: i32, %arg1: i32, %arg2: memref<2xi32, #tpu.memory_space<smem>>, %arg3: memref<2xi32, #tpu.memory_space<smem>>, %arg4: memref<2xi32, #tpu.memory_space<smem>>) -> (i32, i32) {
    %c0_i32 = arith.constant 0 : i32
    %c0_i32_0 = arith.constant 0 : i32
    return %arg0, %c0_i32 : i32, i32
  }
}

</mosaic_0001>

<bundles_post_ra>
// kernel: tpu_custom_call.1
= control target key start
LH: loop header
LB: loop body
LE: loop exit
PB: predicated region body
PF: predicated region fallthrough
CT: control target
= control target key end

     0   :  { %s1663_s0 = inlined_call_operand.hbm [shape: s32[2], index: 0, kind: input, shape index: {}]   ;;  %s1664_s3 = inlined_call_operand.vmem [shape: f32[2,4,128], index: 3, kind: input, shape index: {}]   ;;  %s1665_s4 = inlined_call_operand.vmem [shape: f32[2,4,128], index: 4, kind: input, shape index: {}]   ;;  %s1666_s5 = inlined_call_operand.hbm [shape: f32[2,4,128], index: 5, kind: input, shape index: {}]   ;;  %s1667_s6 = inlined_call_operand.vmem [shape: f32[2,8], index: 6, kind: input, shape index: {}]   ;;  %s1668_s7 = inlined_call_operand.vmem [shape: f32[2,8], index: 7, kind: input, shape index: {}]   ;;  %s1669_s8 = inlined_call_operand.vmem [shape: f32[2,8], index: 8, kind: input, shape index: {}]   ;;  %s1670_s9 = inlined_call_operand.vmem [shape: f32[2,8], index: 9, kind: input, shape index: {}]   ;;  %s1671_s10 = inlined_call_operand.vmem [shape: s32[2,1], index: 10, kind: input, shape index: {}]   ;;  %s1672_s11 = inlined_call_operand.hbm [shape: f32[16,128], index: 11, kind: output, shape index: {0}]   ;;  %s1673_s12 = inlined_call_operand.hbm [shape: f32[16,128], index: 12, kind: output, shape index: {1}]   ;;  %s1674_s13 = inlined_call_operand.hbm [shape: f32[16,128], index: 13, kind: output, shape index: {2}]   ;;  %s1675_s1 = inlined_call_operand.hbm [shape: s32[2], index: 1, kind: input, shape index: {}]   ;;  %s1676_s2 = inlined_call_operand.hbm [shape: s32[2], index: 2, kind: input, shape index: {}]  }
   0x1   :  { %1688 = sst [smem:[#allocation30_spill]] %s1672_s11  ;;  %s984_s27 = scalar_lea.hbm %s1663_s0, 16 }
   0x2   :  { %1689 = sst [smem:[#allocation31_spill]] %s1673_s12  ;;  %p985_p0 = scmp.ne.s32.totalorder %s1663_s0, %s984_s27 }
   0x3   :  { %1690 = sst [smem:[#allocation32_spill]] %s1674_s13  ;;  %p988_p1 = scmp.lt.u32.totalorder %s984_s27, %s1663_s0 }
   0x5   :  { %p990_p2 = pnand %p988_p1, %p985_p0 }
   0x7   :  { %993 = shalt.err (!%p990_p2)  }
   0x8   :  { %s1214_s15 = smov [#allocation4]   ;;  %s994_s20 = scalar_lea.hbm %s1675_s1, 16 }
   0x9   :  { %20 = dma.hbm_to_smem %s1663_s0, 16, %s1214_s15, [#allocation3] }
   0xa   :  { %p995_p3 = scmp.ne.s32.totalorder %s1675_s1, %s994_s20  ;;  %p998_p4 = scmp.lt.u32.totalorder %s994_s20, %s1675_s1 }
   0xc   :  { %p1000_p5 = pnand %p998_p4, %p995_p3 }
   0xe   :  { %1003 = shalt.err (!%p1000_p5)  }
   0xf   :  { %s1215_s25 = smov [#allocation5]   ;;  %s1004_s29 = scalar_lea.hbm %s1676_s2, 16 }
  0x10   :  { %22 = dma.hbm_to_smem %s1675_s1, 16, %s1215_s25, [#allocation3] }
  0x11   :  { %p1005_p6 = scmp.ne.s32.totalorder %s1676_s2, %s1004_s29  ;;  %p1008_p7 = scmp.lt.u32.totalorder %s1004_s29, %s1676_s2 }
  0x13   :  { %p1010_p8 = pnand %p1008_p7, %p1005_p6 }
  0x15   :  { %1013 = shalt.err (!%p1010_p8)  }
  0x16   :  { %s1216_s17 = smov [#allocation6]  }
  0x17   :  { %24 = dma.hbm_to_smem %s1676_s2, 16, %s1216_s17, [#allocation3] }
  0x18   :  { %1164 = dma.done.wait [#allocation3], 48 }
  0x19   :  { %1165 = vsyncadd [#allocation3], 4294967248 }
  0x1a   :  { %26 = sfence }
  0x1b   :  { %27 = vsyncpa [#allocation8], 0 }
  0x1c   :  { %29 = vsyncpa [#allocation8 + $0x1], 0 }
  0x1d   :  { %30 = vsyncpa [#allocation9], 0 }
  0x1e   :  { %32 = vsyncpa [#allocation9 + $0x1], 0 }
  0x1f   :  { %33 = vsyncpa [#allocation12], 0 }
  0x20   :  { %35 = vsyncpa [#allocation12 + $0x1], 0  ;;  %s1329_s1 = smov 0   ;;  %s1331_s20 = smov 0  }
  0x21   :  { %s1333_s21 = smov 0   ;;  %s1335_s22 = smov 0  }
  0x22   :  { %s1337_s23 = smov 0   ;;  %s1339_s2 = smov 0  }
  0x23   :  { %s1341_s24 = smov 0   ;;  %s1343_s25 = smov 0  }
  0x24   :  { %s1345_s26 = smov 0  }
  0x25 LB: > { %1691 = sst [smem:[#allocation22_spill]] %s1180_s1  ;;  %s1373_s27 = sadd.s32 4294967295, %s1212_s26   ;;  %s1212_s26 = sphi %s1345_s26, %s41_s26   ;;  %s1208_s25 = sphi %s1343_s25, %s1722_s25   ;;  %s1204_s24 = sphi %s1341_s24, %s1727_s24   ;;  %s1200_s2 = sphi %s1339_s2, %s1720_s2   ;;  %s1196_s23 = sphi %s1337_s23, %s1726_s23   ;;  %s1192_s22 = sphi %s1335_s22, %s1725_s22   ;;  %s1188_s21 = sphi %s1333_s21, %s1718_s21   ;;  %s1184_s20 = sphi %s1331_s20, %s1724_s20   ;;  %s1180_s1 = sphi %s1329_s1, %s1723_s1  }
  0x26   : > { %1692 = sst [smem:[#allocation23_spill]] %s1188_s21  ;;  %s53_s28 = sadd.s32 1, %s1208_s25 }
  0x27   : > { %1693 = sst [smem:[#allocation24_spill]] %s1200_s2  ;;  %p55_p9 = scmp.ge.s32.totalorder %s53_s28, 2 }
  0x28   : > { %1694 = sst [smem:[#allocation25_spill]] %s1208_s25  ;;  %s136_s14 = sadd.s32 1, %s1200_s2 }
  0x29   : > { %s126_s29 = sld [smem:[#allocation4 + %s1208_s25]]  ;;  %s1729_s28 = smov (%p55_p9, %s53_s28), 0 }
  0x2a   : > { %s127_s30 = sld [smem:[#allocation5 + %s1208_s25]]  ;;  %p143_p10 = scmp.ne.s32.totalorder %s1200_s2, %s1196_s23 }
  0x2b   : > { %1695 = sst [smem:[#allocation26_spill]] %s1729_s28  ;;  %p149_p11 = scmp.ne.s32.totalorder %s1196_s23, %s1192_s22 }
  0x2c   : > { %s129_s15 = sld [smem:[#allocation4 + %s1729_s28]]  ;;  %p144_p12 = scmp.eq.s32.totalorder %s1212_s26, 0 }
  0x2d   : > { %s130_s16 = sld [smem:[#allocation5 + %s1729_s28]]  ;;  %p150_p13 = scmp.eq.s32.totalorder %s1373_s27, 0 }
  0x2e   : > { %s264_s17 = ssub.s32 %s1208_s25, %s1729_s28  ;;  %s267_s18 = sadd.s32 1, %s1188_s21 }
  0x2f   : > { %p1392_p0 = por %p150_p13, %p149_p11  ;;  %p265_p1 = scmp.eq.s32.totalorder %s264_s17, 0 }
  0x30   : > { %p277_p2 = scmp.ne.s32.totalorder %s1188_s21, %s1184_s20  ;;  %p278_p3 = scmp.eq.s32.totalorder %s1373_s27, 1 }
  0x31   : > { %s1696_s19 = scalar_select %p1392_p0, 1, 0 }
  0x32   : > { %s1400_s22 = scalar_select %p265_p1, %s1188_s21, %s267_s18  }
  0x33   : > { %s131_s0 = ssub.s32 %s126_s29, %s129_s15  ;;  %s132_s13 = ssub.s32 %s127_s30, %s130_s16 }
  0x34   : > { %1697 = sst [smem:[#allocation27_spill]] %s1400_s22  ;;  %s133_s11 = sor.u32 %s132_s13, %s131_s0 }
  0x35   : > { %p1402_p4 = por %p278_p3, %p277_p2  ;;  %p134_p5 = scmp.eq.s32.totalorder %s133_s11, 0 }
  0x36   : > { %p283_p6 = scmp.ne.s32.totalorder %s1184_s20, %s1180_s1  ;;  %s1699_s12 = sadd.s32 4294967294, %s1212_s26  }
  0x37   : > { %s1698_s28 = scalar_select %p1402_p4, 1, 0 }
  0x38   : > { %p284_p7 = scmp.eq.s32.totalorder %s1699_s12, 1  ;;  %p1419_p9 = por %p144_p12, %p143_p10 }
  0x39   : > { %s1412_s17 = scalar_select %p134_p5, %s1200_s2, %s136_s14  }
  0x3a   : > { %p1423_p11 = por %p284_p7, %p283_p6  ;;  %p902_p13 = scmp.lt.s32.totalorder %s1212_s26, 2 }
  0x3b   : > { %1700 = sst [smem:[#allocation28_spill]] %s1412_s17  ;;  %s403_s12 = sand.u32 1, %s1200_s2  }
  0x3c   : > { %s1702_s11 = scalar_select %p1423_p11, 1, 0 }
  0x3d   : > { %s847_s13 = sshll.u32 %s403_s12, 2  ;;  %p1431_p1 = pnand %p902_p13, %p1419_p9 }
  0x3e   : > { %1703 = sst [smem:[#allocation29_spill]] %s1702_s11  ;;  %p849_p10 = scmp.ge.s32.totalorder %s1212_s26, 1 }
  0x3f   : > { %s872_s30 = scalar_select %p1419_p9, [#allocation4], [#allocation14] }
  0x40   : > { %s873_s14 = scalar_select %p1419_p9, %s1208_s25, 0 }
  0x41   : > { %s1731_s30 = smov (!%p902_p13, %s872_s30), [#allocation16]  ;;  %p423_p12 = scmp.lt.s32.totalorder %s1212_s26, 3 }
  0x42   : > { %s1733_s14 = smov (!%p902_p13, %s873_s14), 0  ;;  %s407_s2 = scalar_lea.vmem [#allocation7], %s847_s13 }
  0x43   : > { %s874_s15 = scalar_select %p1419_p9, [#allocation5], [#allocation15] }
  0x44   : > { %s409_s16 = sld [smem:[%s1731_s30 + %s1733_s14]]  ;;  %p1444_p2 = pnand %p849_p10, %p423_p12 }
  0x45   : > { %s1735_s15 = smov (!%p902_p13, %s874_s15), [#allocation17]  ;;  %s418_s22 = sshll.u32 %s407_s2, 4  ;;  %s1448_s22 = int_to_ptr.vmem [resolvable:$true] %s418_s22 }
  0x46   : > { %s410_s18 = sld [smem:[%s1735_s15 + %s1733_s14]]  ;;  %s404_s30 = scalar_lea.sflag [#allocation8], %s403_s12 }
  0x47   : > { %p1016_p5 = pneg %p1431_p1  ;;  %s1019_s13 = scalar_lea.hbm %s1666_s5, 128 }
  0x4c   : > { %s414_s21 = sadd.s32 %s410_s18, %s409_s16 }
  0x4d   : > { %s848_s25 = sshll.u32 %s414_s21, 6 }
  0x4e   : > { %s1453_s1 = scalar_lea.hbm %s1666_s5, %s848_s25 }
  0x4f   : > { %s1014_s14 = scalar_lea.hbm %s1453_s1, 64  ;;  %p1020_p9 = scmp.lt.u32.totalorder %s1453_s1, %s1666_s5 }
  0x50   : > { %p1015_p3 = scmp.ne.s32.totalorder %s1453_s1, %s1014_s14  ;;  %p1021_p13 = scmp.lt.u32.totalorder %s1019_s13, %s1014_s14 }
  0x51   : > { %p1023_p12 = scmp.lt.u32.totalorder %s1014_s14, %s1453_s1 }
  0x52   : > { %p1017_p6 = pnand %p1016_p5, %p1015_p3  ;;  %p1022_p10 = por %p1021_p13, %p1020_p9 }
  0x54   : > { %p1018_p7 = pneg %p1017_p6  ;;  %p1024_p8 = por %p1023_p12, %p1022_p10 }
  0x56   : > { %p1025_p11 = pnand %p1024_p8, %p1018_p7 }
  0x58   : > { %1028 = shalt.err (!%p1025_p11)
}
  0x59   : > { %s1029_s12 = scalar_lea.vmem %s1448_s22, 64  ;;  %s1217_s15 = smov [#allocation7]  }
  0x5a   : > { %p1030_p3 = scmp.ne.s32.totalorder %s1448_s22, %s1029_s12  ;;  %s1034_s16 = sshll.u32 %s1217_s15, 4  ;;  %s1035_s16 = int_to_ptr.vmem [resolvable:$false] %s1034_s16 }
  0x5b   : > { %s1036_s18 = scalar_lea.vmem %s1035_s16, 128  ;;  %p1037_p0 = scmp.lt.s32.totalorder %s1448_s22, %s1035_s16 }
  0x5c   : > { %p1032_p6 = pnand %p1030_p3, %p1016_p5  ;;  %p1038_p9 = scmp.lt.s32.totalorder %s1036_s18, %s1029_s12 }
  0x5e   : > { %p1033_p4 = pneg %p1032_p6  ;;  %p1039_p13 = por %p1038_p9, %p1037_p0 }
  0x60   : > { %p1040_p10 = pnand %p1039_p13, %p1033_p4 }
  0x62   : > { %1043 = shalt.err (!%p1040_p10)
}
  0x63   : > { %891 = dma.hbm_to_vmem [thread:$0]  (!%p1431_p1), %s1453_s1, 64, %s1448_s22, %s404_s30  }
  0x64   : > { %427 = sbr.rel (%p1444_p2) target bundleno = 566 (0x236), region = 52  ;;  %s429_s29 = sand.u32 (!%p1444_p2), 1, %s1196_s23  }
  0x65   : > { %s850_s14 = sshll.u32 (!%p1444_p2), %s429_s29, 2  ;;  %s430_s2 = scalar_lea.sflag (!%p1444_p2), [#allocation8], %s429_s29 }
  0x66   : > { %s433_s21 = scalar_lea.vmem (!%p1444_p2), [#allocation7], %s850_s14  ;;  %p1706_p8 = scmp.ne.s32.totalorder (!%p1444_p2), %s1696_s19, 0 }
  0x6b   : > { %1167 = dma.done.wait (%p1706_p8), %s430_s2, 64  }
  0x6c   : > { %1169 = vsyncadd (%p1706_p8), %s430_s2, 4294967232  ;;  %s501_s1 = sld [smem:[#allocation4 + %s1204_s24]]  ;;  %v536_v0 = vlaneseq  ;;  %v544_v2 = vld [vmem:[%s433_s21] sm:$0xf]  ;;  %vm554_vm1 = vcmask 1043456   ;;  %s483_s2 = sand.u32 1, %s1184_s20  }
  0x6d   : > { %s502_s22 = sld [smem:[#allocation5 + %s1204_s24]]  ;;  %s1501_s21 = sshll.u32 %s483_s2, 3  ;;  %v1218_v16 = vmov 0.0  }
  0x6e   : > { %s514_s17 = sld [smem:[#allocation4 + %s1204_s24]]  ;;  %v537_v1 = vshrl.u32 %v536_v0, 7  ;;  %v540_v5 = vand.u32 127, %v536_v0  ;;  %p575_p2 = scmp.eq.s32.totalorder %s1204_s24, 0 }
  0x6f   : > { %s515_s0 = sld [smem:[#allocation5 + %s1204_s24]]  ;;  %v580_v25 = vld [vmem:[%s1671_s10] sm:$0x3] (%p575_p2)  ;;  %v1219_v26 = vmov (%p575_p2), 0   ;;  %vm593_vm2 = vcmask (%p575_p2), 58368  }
  0x70   : > { %s535_s13 = sld [smem:[#allocation6 + %s1204_s24]]  ;;  %v538_v4 = vmul.u32 128, %v537_v1  ;;  %981 = vset.pattern.permute.xlu0 (%p575_p2), %v1219_v26  ;;  %v585_v27 = vld [vmem:[%s1668_s7] sm:$0x3] (%p575_p2) }
  0x71   : > { %v586_v28 = vadd.f32 (%p575_p2), 1.0, %v585_v27  ;;  %v606_v31 = vld [vmem:[%s1669_s8] sm:$0x3] (%p575_p2) }
  0x72   : > { %p503_p0 = scmp.lt.s32.totalorder %s501_s1, 1  ;;  %v541_v7 = vadd.s32 %v540_v5, %v538_v4  ;;  %v607_v32 = vld [vmem:[%s1670_s9] sm:$0x3] (%p575_p2) }
  0x73   : > { %p505_p4 = scmp.lt.s32.totalorder %s502_s22, 0  ;;  %982 = vlog2.f32 (%p575_p2), %v586_v28  ;;  %v589_v33 = vld [vmem:[%s1667_s6] sm:$0x3] (%p575_p2)  ;;  %v608_v34 = vsub.f32 (%p575_p2), %v606_v31, %v607_v32 }
  0x74   : > { %p516_p11 = scmp.lt.s32.totalorder %s514_s17, 1  ;;  %s1737_s1 = smov (!%p503_p0, %s501_s1), 1 }
  0x75   : > { %p518_p1 = scmp.lt.s32.totalorder %s515_s0, 0  ;;  %s1739_s22 = smov (!%p505_p4, %s502_s22), 0  ;;  %v609_v36 = vmul.f32 (%p575_p2), %v608_v34, %v608_v34 }
  0x76   : > { %s1741_s17 = smov (!%p516_p11, %s514_s17), 1  ;;  %s507_s30 = sadd.s32 %s1739_s22, %s1737_s1  ;;  %v542_v9 = vstv %s535_s13 }
  0x77   : > { %s854_s19 = sshll.u32 %s507_s30, 2  ;;  %s1743_s0 = smov (!%p518_p1, %s515_s0), 0  ;;  %vm543_vm0 = vcmp.lt.s32.totalorder %v541_v7, %v542_v9 }
  0x78   : > { %s509_s12 = scalar_lea.vmem %s1664_s3, %s854_s19  ;;  %s520_s15 = sadd.s32 %s1743_s0, %s1741_s17 }
  0x79   : > { %v548_v3 = vld [vmem:[%s509_s12] sm:$0xf]  ;;  %s855_s16 = sshll.u32 %s520_s15, 2  ;;  %s1504_s1 = scalar_lea.vmem [#allocation11], %s1501_s21 }
  0x7a   : > { %v549_v6 = vsub.f32 %v548_v3, %v544_v2  ;;  %s522_s14 = scalar_lea.vmem %s1665_s4, %s855_s16  ;;  %573 = vst [vmem:[%s1504_s1] sm:$0xff] %v1218_v16  ;;  %s1508_s22 = scalar_lea.vmem [#allocation13], %s1501_s21 }
  0x7b   : > { %v545_v8 = vld [vmem:[%s522_s14] sm:$0xf]  ;;  %574 = vst [vmem:[%s1508_s22] sm:$0xff] %v1218_v16  ;;  %s485_s0 = scalar_lea.vmem [#allocation10], %s1501_s21 }
  0x7c   : > { %v546_v10 = vsub.f32 %v545_v8, %v544_v2  ;;  %v550_v11 = vand.u32 2147483647, %v549_v6 }
  0x7d   : > { %v983_v29 = vpop.eup (%p575_p2), %982 }
  0x7e   : > { %v547_v12 = vand.u32 2147483647, %v546_v10  ;;  %v588_v30 = vmul.f32 (%p575_p2), 0.6931472, %v983_v29 }
  0x80   : > { %v551_v13 = vadd.f32 %v550_v11, %v547_v12  ;;  %v590_v35 = vsub.f32 (%p575_p2), %v589_v33, %v588_v30 }
  0x82   : > { %v552_v14 = vsel %vm543_vm0, %v551_v13, 0.0  ;;  %v591_v37 = vmul.f32 (%p575_p2), %v590_v35, %v590_v35 }
  0x83   : > { %v555_v15 = vsel %vm554_vm1, %v552_v14, 0.0 }
  0x84   : > { %556 = vadd.xlane.f32.xlu0 %v555_v15 }
  0x9a   : > { %582 = vperm.xlu0 (%p575_p2), %981, %v580_v25  }
 0x111   : > { %v557_v17 = vpop.xlane.xlu0 %556 }
 0x112   : > { %v558_v18 = vrot.slane %v557_v17, 4 }
 0x114   : > { %v559_v19 = vadd.f32 %v558_v18, %v557_v17 }
 0x116   : > { %v560_v20 = vrot.slane %v559_v19, 2 }
 0x118   : > { %v561_v21 = vadd.f32 %v560_v20, %v559_v19 }
 0x119   : > { %v583_v38 = vpop.permute.xlu0 (%p575_p2), %582 }
 0x11a   : > { %v562_v22 = vrot.slane %v561_v21, 1  ;;  %vm584_vm3 = vcmp.lt.s32.totalorder (%p575_p2), %v540_v5, %v583_v38 }
 0x11b   : > { %v610_v39 = vsel (%p575_p2), %vm584_vm3, %v609_v36, 0.0  ;;  %v592_v40 = vsel (%p575_p2), %vm584_vm3, %v591_v37, 0.0 }
 0x11c   : > { %v563_v23 = vadd.f32 %v562_v22, %v561_v21  ;;  %v611_v41 = vsel (%p575_p2), %vm593_vm2, %v610_v39, 0.0  ;;  %v594_v42 = vsel (%p575_p2), %vm593_vm2, %v592_v40, 0.0 }
 0x11d   : > { %612 = vadd.xlane.f32.xlu1 (%p575_p2), %v611_v41  ;;  %595 = vadd.xlane.f32.xlu0 (%p575_p2), %v594_v42 }
 0x11e   : > { %866 = vpush %v563_v23 }
 0x14b   : > { %579 = sbr.rel (!%p575_p2) target bundleno = 492 (0x1ec), region = 68 }
 0x14f   : > { %s867_s17 = spop %866 }
 0x150   : > { %v565_v24 = vstv %s867_s17 }
 0x151   : > { %572 = vst [vmem:[%s485_s0] sm:$0xff] %v565_v24 }
 0x1aa   : > { %v613_v43 = vpop.xlane.xlu1 %612  ;;  %v596_v44 = vpop.xlane.xlu0 %595 }
 0x1ab   : > { %v614_v45 = vrot.slane %v613_v43, 4  ;;  %v597_v46 = vrot.slane %v596_v44, 4 }
 0x1ad   : > { %v615_v47 = vadd.f32 %v614_v45, %v613_v43  ;;  %v598_v48 = vadd.f32 %v597_v46, %v596_v44 }
 0x1af   : > { %v616_v49 = vrot.slane %v615_v47, 2  ;;  %v599_v50 = vrot.slane %v598_v48, 2 }
 0x1b1   : > { %v617_v51 = vadd.f32 %v616_v49, %v615_v47  ;;  %v600_v52 = vadd.f32 %v599_v50, %v598_v48 }
 0x1b3   : > { %v601_v53 = vrot.slane %v600_v52, 1  ;;  %v618_v54 = vrot.slane %v617_v51, 1 }
 0x1b5   : > { %v602_v55 = vadd.f32 %v601_v53, %v600_v52  ;;  %v619_v56 = vadd.f32 %v618_v54, %v617_v51 }
 0x1b7   : > { %868 = vpush %v602_v55 }
 0x1b8   : > { %870 = vpush %v619_v56 }
 0x1e8   : > { %s869_s14 = spop %868 }
 0x1e9   : > { %v604_v57 = vstv %s869_s14  ;;  %s871_s17 = spop %870 }
 0x1ea   : > { %605 = vst [vmem:[%s1504_s1] sm:$0xff] %v604_v57  ;;  %v621_v58 = vstv %s871_s17 }
 0x1eb   : > { %622 = vst [vmem:[%s1508_s22] sm:$0xff] %v621_v58 }
 0x1ec PF: > { %s628_s30 = sand.u32 1, %s1373_s27   ;;  %s1534_s19 = sshll.u32 %s1204_s24, 7 }
 0x1ed   : > { %s1707_s25 = sld [smem:[#allocation31_spill]]  ;;  %s660_s16 = sshll.u32 %s1504_s1, 4  ;;  %s1543_s16 = int_to_ptr.vmem [resolvable:$true] %s660_s16 }
 0x1ee   : > { %s1709_s14 = sld [smem:[#allocation30_spill]]  ;;  %s1551_s24 = scalar_lea.sflag [#allocation12], %s628_s30 }
 0x1ef   : > { %s1044_s27 = scalar_lea.vmem %s1543_s16, 128  ;;  %p1710_p7 = scmp.ne.s32.totalorder %s1698_s28, 0 }
 0x1f0   : > { %p1045_p5 = scmp.ne.s32.totalorder %s1543_s16, %s1044_s27  ;;  %s1220_s13 = smov [#allocation11]  }
 0x1f1   : > { %s1048_s11 = sshll.u32 %s1220_s13, 4  ;;  %s1049_s11 = int_to_ptr.vmem [resolvable:$false] %s1048_s11 }
 0x1f2   : > { %p1046_p12 = pnand %p1045_p5, %p1710_p7  ;;  %s1050_s1 = scalar_lea.vmem %s1049_s11, 256 }
 0x1f3   : > { %s1708_s12 = smov %s1707_s25  ;;  %s1540_s15 = scalar_lea.hbm %s1707_s25, %s1534_s19 }
 0x1f4   : > { %s1549_s17 = scalar_lea.hbm %s1709_s14, %s1534_s19  ;;  %p1047_p3 = pneg %p1046_p12 }
 0x1f5   : > { %p1051_p6 = scmp.lt.s32.totalorder %s1543_s16, %s1049_s11  ;;  %p1052_p9 = scmp.lt.s32.totalorder %s1050_s1, %s1044_s27 }
 0x1f7   : > { %p1053_p13 = por %p1052_p9, %p1051_p6 }
 0x1f9   : > { %p1054_p10 = pnand %p1053_p13, %p1047_p3 }
 0x1fb   : > { %1057 = shalt.err (!%p1054_p10)
}
 0x1fc   : > { %s1058_s30 = scalar_lea.hbm %s1540_s15, 128  ;;  %s1062_s29 = scalar_lea.hbm %s1708_s12, 256 }
 0x1fd   : > { %p1059_p8 = scmp.ne.s32.totalorder %s1540_s15, %s1058_s30  ;;  %p1063_p11 = scmp.lt.u32.totalorder %s1540_s15, %s1708_s12 }
 0x1fe   : > { %p1064_p1 = scmp.lt.u32.totalorder %s1062_s29, %s1058_s30  ;;  %p1066_p5 = scmp.lt.u32.totalorder %s1058_s30, %s1540_s15 }
 0x1ff   : > { %p1060_p0 = pnand %p1059_p8, %p1710_p7 }
 0x200   : > { %p1065_p2 = por %p1064_p1, %p1063_p11 }
 0x201   : > { %p1061_p4 = pneg %p1060_p0 }
 0x202   : > { %p1067_p12 = por %p1066_p5, %p1065_p2 }
 0x204   : > { %p1068_p3 = pnand %p1067_p12, %p1061_p4 }
 0x206   : > { %1071 = shalt.err (!%p1068_p3)
}
 0x207   : > { %879 = dma.vmem_to_hbm [thread:$0]  (%p1710_p7), %s1543_s16, 128, %s1540_s15, %s1551_s24  }
 0x208   : > { %s647_s27 = sshll.u32 %s485_s0, 4  ;;  %s1711_s18 = sld [smem:[#allocation32_spill]]  ;;  %s1583_s27 = int_to_ptr.vmem [resolvable:$true] %s647_s27 }
 0x209   : > { %s673_s29 = sshll.u32 %s1508_s22, 4  ;;  %s624_s13 = scalar_lea.sflag [#allocation9], %s483_s2  ;;  %s674_s29 = int_to_ptr.vmem [resolvable:$true] %s673_s29 }
 0x20a   : > { %s1072_s11 = scalar_lea.vmem %s1583_s27, 128  ;;  %s1221_s21 = smov [#allocation10]  }
 0x20b   : > { %p1073_p6 = scmp.ne.s32.totalorder %s1583_s27, %s1072_s11  ;;  %s1076_s0 = sshll.u32 %s1221_s21, 4  ;;  %s1077_s0 = int_to_ptr.vmem [resolvable:$false] %s1076_s0 }
 0x20c   : > { %s1078_s15 = scalar_lea.vmem %s1077_s0, 256  ;;  %p1079_p10 = scmp.lt.s32.totalorder %s1583_s27, %s1077_s0 }
 0x20d   : > { %p1074_p9 = pnand %p1073_p6, %p1710_p7  ;;  %p1080_p8 = scmp.lt.s32.totalorder %s1078_s15, %s1072_s11 }
 0x20e   : > { %s1581_s30 = scalar_lea.hbm %s1711_s18, %s1534_s19 }
 0x20f   : > { %p1075_p13 = pneg %p1074_p9  ;;  %p1081_p0 = por %p1080_p8, %p1079_p10 }
 0x211   : > { %p1082_p4 = pnand %p1081_p0, %p1075_p13 }
 0x213   : > { %1085 = shalt.err (!%p1082_p4)
}
 0x214   : > { %s1086_s2 = scalar_lea.hbm %s1549_s17, 128  ;;  %s1090_s1 = scalar_lea.hbm %s1709_s14, 256 }
 0x215   : > { %p1087_p11 = scmp.ne.s32.totalorder %s1549_s17, %s1086_s2  ;;  %p1091_p5 = scmp.lt.u32.totalorder %s1549_s17, %s1709_s14 }
 0x216   : > { %p1092_p12 = scmp.lt.u32.totalorder %s1090_s1, %s1086_s2  ;;  %p1094_p6 = scmp.lt.u32.totalorder %s1086_s2, %s1549_s17 }
 0x217   : > { %p1088_p1 = pnand %p1087_p11, %p1710_p7 }
 0x218   : > { %p1093_p3 = por %p1092_p12, %p1091_p5 }
 0x219   : > { %p1089_p2 = pneg %p1088_p1 }
 0x21a   : > { %p1095_p9 = por %p1094_p6, %p1093_p3 }
 0x21c   : > { %p1096_p13 = pnand %p1095_p9, %p1089_p2 }
 0x21e   : > { %1099 = shalt.err (!%p1096_p13)
}
 0x21f   : > { %878 = dma.vmem_to_hbm [thread:$0]  (%p1710_p7), %s1583_s27, 128, %s1549_s17, %s624_s13  }
 0x220   : > { %s1100_s11 = scalar_lea.vmem %s674_s29, 128  ;;  %s1222_s0 = smov [#allocation13]  }
 0x221   : > { %p1101_p10 = scmp.ne.s32.totalorder %s674_s29, %s1100_s11  ;;  %s1104_s15 = sshll.u32 %s1222_s0, 4  ;;  %s1105_s15 = int_to_ptr.vmem [resolvable:$false] %s1104_s15 }
 0x222   : > { %s1106_s2 = scalar_lea.vmem %s1105_s15, 256  ;;  %p1107_p4 = scmp.lt.s32.totalorder %s674_s29, %s1105_s15 }
 0x223   : > { %p1102_p8 = pnand %p1101_p10, %p1710_p7  ;;  %p1108_p11 = scmp.lt.s32.totalorder %s1106_s2, %s1100_s11 }
 0x225   : > { %p1103_p0 = pneg %p1102_p8  ;;  %p1109_p1 = por %p1108_p11, %p1107_p4 }
 0x227   : > { %p1110_p2 = pnand %p1109_p1, %p1103_p0 }
 0x229   : > { %1113 = shalt.err (!%p1110_p2)
}
 0x22a   : > { %s1114_s22 = scalar_lea.hbm %s1581_s30, 128  ;;  %s1118_s13 = scalar_lea.hbm %s1711_s18, 256 }
 0x22b   : > { %p1115_p5 = scmp.ne.s32.totalorder %s1581_s30, %s1114_s22  ;;  %p1119_p6 = scmp.lt.u32.totalorder %s1581_s30, %s1711_s18 }
 0x22c   : > { %p1120_p9 = scmp.lt.u32.totalorder %s1118_s13, %s1114_s22  ;;  %p1122_p10 = scmp.lt.u32.totalorder %s1114_s22, %s1581_s30 }
 0x22d   : > { %p1116_p12 = pnand %p1115_p5, %p1710_p7 }
 0x22e   : > { %p1121_p13 = por %p1120_p9, %p1119_p6 }
 0x22f   : > { %p1117_p3 = pneg %p1116_p12 }
 0x230   : > { %p1123_p8 = por %p1122_p10, %p1121_p13 }
 0x232   : > { %p1124_p0 = pnand %p1123_p8, %p1117_p3 }
 0x234   : > { %1127 = shalt.err (!%p1124_p0)
}
 0x235   : > { %880 = dma.vmem_to_hbm [thread:$0]  (%p1710_p7), %s674_s29, 128, %s1581_s30, %s1551_s24  }
 0x236 PF: > { %s1712_s1 = sld [smem:[#allocation22_spill]]  ;;  %s1713_s25 = sld [smem:[#allocation29_spill]] }
 0x237   : > { %p1715_p11 = scmp.ge.s32.totalorder %s1212_s26, 2 }
 0x23c   : > { %s685_s21 = sand.u32 1, %s1712_s1   ;;  %p1714_p4 = scmp.ne.s32.totalorder %s1713_s25, 0 }
 0x23d   : > { %s686_s11 = scalar_lea.sflag [#allocation9], %s685_s21 }
 0x23e   : > { %p893_p1 = pnand %p1715_p11, %p1714_p4 }
 0x240   : > { %1171 = dma.done.wait (!%p893_p1), %s686_s11, 128  }
 0x241   : > { %1173 = vsyncadd (!%p893_p1), %s686_s11, 4294967168  ;;  %s1716_s0 = sadd.s32 4294967294, %s1212_s26  }
 0x242   : > { %s694_s15 = sand.u32 1, %s1716_s0  }
 0x243   : > { %s695_s2 = scalar_lea.sflag [#allocation12], %s694_s15 }
 0x244   : > { %1175 = dma.done.wait (!%p893_p1), %s695_s2, 256  }
 0x245   : > { %1177 = vsyncadd (!%p893_p1), %s695_s2, 4294967040  ;;  %s41_s26 = sadd.s32 1, %s1212_s26   ;;  %s1717_s28 = sld [smem:[#allocation23_spill]] }
 0x246   : > { %p38_p7 = scmp.ge.s32.totalorder %s41_s26, 4   ;;  %s1718_s21 = sld [smem:[#allocation27_spill]] }
 0x247   : > { %s1719_s24 = sld [smem:[#allocation24_spill]]  ;;  %s1720_s2 = sld [smem:[#allocation28_spill]] }
 0x248   : > { %s1721_s30 = sld [smem:[#allocation25_spill]]  ;;  %s1722_s25 = sld [smem:[#allocation26_spill]] }
 0x249   : > { %s1723_s1 = smov %s1184_s20  ;;  %s1725_s22 = smov %s1196_s23 }
 0x24a   :  { %40 = sbr.rel (!%p38_p7) target bundleno = 37 (0x25), region = 147 }
 0x24b   : > { %s1724_s20 = smov %s1717_s28 }
 0x24d   : > { %s1726_s23 = smov %s1719_s24 }
 0x24e   : > { %s1727_s24 = smov %s1721_s30 }
 0x251   :  { %709 = vsyncpa [#allocation8], 1 }
 0x252   :  { %711 = vsyncpa [#allocation8 + $0x1], 1 }
 0x253   :  { %712 = vsyncpa [#allocation9], 1 }
 0x254   :  { %714 = vsyncpa [#allocation9 + $0x1], 1 }
 0x255   :  { %715 = vsyncpa [#allocation12], 1 }
 0x256   :  { %717 = vsyncpa [#allocation12 + $0x1], 1 }

</bundles_post_ra>
